<compile_context>
chip_gen: v7x
topology: tpu7x:2x2x1
jax: 0.10.0
libtpu: 0.0.40
codegen_flags: <defaults>
</compile_context>

<pallas_src>
import functools

import jax
import jax.numpy as jnp
from jax.experimental import pallas as pl
from jax.experimental.pallas import tpu as pltpu


def _silu(x):
    # SiLU(x) = x * sigmoid(x); sigmoid lowers to the EUP, mul to the VPU.
    return x * jax.nn.sigmoid(x)


def _round_up(x, m):
    return (x + m - 1) // m * m


def _mlp_kernel(n_layers, activate_last, xt_ref, *refs):
    """Fused MLP, feature-major: every tensor lives as (features, tile_n).

    refs = (w1t, b1, w2t, b2, ..., wLt, bL, out) with
      wit : (out_i, in_i)  bf16   (pre-transposed weight)
      bi  : (out_i, 1)     f32    (column bias, broadcast over lanes)
      out : (f_out, tile_n)
    The batch dimension stays on the 128-lane axis throughout, so the small
    feature dims never waste vreg lanes and all stores are unmasked.
    """
    o_ref = refs[-1]
    h = xt_ref[...]                                     # (f_in, tile_n) bf16
    for li in range(n_layers):
        wt_ref = refs[2 * li]
        b_ref = refs[2 * li + 1]
        # h^T_{l+1}[o, m] = sum_i wt[o, i] * h^T[i, m]   (f32 accumulation)
        h = jnp.dot(wt_ref[...], h.astype(wt_ref.dtype),
                    preferred_element_type=jnp.float32) + b_ref[...]
        if li < n_layers - 1 or activate_last:
            h = _silu(h)
    o_ref[...] = h.astype(o_ref.dtype)


def mlp_pallas(x, params, *, activate_last=False, tile_n_max=512,
               compute_dtype=jnp.bfloat16):
    """Run the fused MLP kernel, tiling over the batch/row dimension."""
    n, f_in = x.shape
    n_layers = len(params)
    f_out = params[-1][0].shape[1]
    out_dtype = x.dtype

    # --- batch tile selection -------------------------------------------------
    # Feature-major blocks put the batch on the lane axis, so tiles are
    # multiples of 128 rows.  Small batches -> one tile (v5e/v6e: single TC,
    # grid is a serial loop, fewer steps = less fixed overhead).  n_pad >= 256
    # -> split into >= 2 even tiles so the "parallel" axis feeds both v7x
    # TensorCores; on single-TC chips that costs only one extra pipeline step.
    n_r = _round_up(max(n, 1), 128)
    if n_r <= 128:
        tile_n = n_r
    else:
        tile_n = max(128, min(_round_up(tile_n_max, 128),
                              _round_up(n_r // 2, 128)))
    n_pad = _round_up(n, tile_n)
    num_tiles = n_pad // tile_n

    # --- lane-dense, feature-major operands -------------------------------------
    if n_pad != n:
        x = jnp.pad(x, ((0, n_pad - n), (0, 0)))
    xt = jnp.transpose(x).astype(compute_dtype)         # (f_in, n_pad) bf16

    operands = [xt]
    const_shapes = []
    for w, b in params:
        in_dim, out_dim = w.shape
        operands.append(jnp.transpose(w).astype(compute_dtype))   # (out, in) bf16
        operands.append(b.reshape(out_dim, 1).astype(jnp.float32))  # (out, 1) f32
        const_shapes += [(out_dim, in_dim), (out_dim, 1)]

    # --- cost estimate ----------------------------------------------------------
    layer_dims = [w.shape for w, _ in params]
    flops = 2 * n_pad * sum(i * o for i, o in layer_dims)
    transcendentals = n_pad * sum(
        o for li, (_, o) in enumerate(layer_dims)
        if li < n_layers - 1 or activate_last)
    bytes_accessed = (n_pad * f_in * 2                               # x (bf16)
                      + sum(i * o for i, o in layer_dims) * 2        # W (bf16)
                      + sum(o for _, o in layer_dims) * 4            # biases (f32)
                      + n_pad * f_out * jnp.dtype(out_dtype).itemsize)
    cost = pl.CostEstimate(flops=flops, transcendentals=transcendentals,
                           bytes_accessed=bytes_accessed)

    kernel = functools.partial(_mlp_kernel, n_layers, activate_last)

    def _build(single_buffer_weights):
        const_specs = []
        for shape in const_shapes:
            idx = lambda i, _nd=len(shape): (0,) * _nd
            if single_buffer_weights:
                # Grid-invariant blocks: no point double-buffering them.
                const_specs.append(
                    pl.BlockSpec(shape, idx, pipeline_mode=pl.Buffered(1)))
            else:
                const_specs.append(pl.BlockSpec(shape, idx))
        in_specs = ([pl.BlockSpec((f_in, tile_n), lambda i: (0, i))]
                    + const_specs)
        return pl.pallas_call(
            kernel,
            out_shape=jax.ShapeDtypeStruct((f_out, n_pad), out_dtype),
            grid_spec=pltpu.PrefetchScalarGridSpec(
                num_scalar_prefetch=0,
                grid=(num_tiles,),
                in_specs=in_specs,
                out_specs=pl.BlockSpec((f_out, tile_n), lambda i: (0, i)),
            ),
            compiler_params=pltpu.CompilerParams(
                dimension_semantics=("parallel",)),
            cost_estimate=cost,
        )

    try:
        out_t = _build(single_buffer_weights=True)(*operands)
    except Exception:
        # pipeline_mode=pl.Buffered not accepted on this jax build; the default
        # double-buffered pipeline is correct and only costs ~4 KB extra VMEM.
        out_t = _build(single_buffer_weights=False)(*operands)

    # Lane-dense (f_out, n_pad) slab -> (n, f_out) to match the module output.
    return jnp.transpose(out_t)[:n]


def init_mlp_params(key, input_feat, output_feat, latent_feat, n_layers=3,
                    zero_bias=False):
    """Xavier-uniform weights matching torch.nn.init.xavier_uniform_.

    The PyTorch module zero-inits biases; optionally use small random biases so
    the bias-add path is exercised by the numeric check.  Weights are stored as
    (in, out) == PyTorch weight.T.
    """
    dims = [input_feat] + [latent_feat] * (n_layers - 1) + [output_feat]
    params = []
    for in_dim, out_dim in zip(dims[:-1], dims[1:]):
        key, kw, kb = jax.random.split(key, 3)
        bound = (6.0 / (in_dim + out_dim)) ** 0.5
        w = jax.random.uniform(kw, (in_dim, out_dim), jnp.float32,
                               minval=-bound, maxval=bound)
        if zero_bias:
            b = jnp.zeros((1, out_dim), jnp.float32)
        else:
            b = jax.random.uniform(kb, (1, out_dim), jnp.float32,
                                   minval=-0.1, maxval=0.1)
        params.append((w, b))
    return params


def mlp_reference(x, params, activate_last=False):
    """Pure-JAX f32 reference of the same forward pass."""
    n_layers = len(params)
    h = x
    for i, (w, b) in enumerate(params):
        h = h @ w + b
        if i < n_layers - 1 or activate_last:
            h = h * jax.nn.sigmoid(h)
    return h


if __name__ == "__main__":
    # Small shapes: N=512 rows, input_feat=16, latent_feat=32, output_feat=8.
    # 512 rows -> two 256-row "parallel" tiles (both v7x TCs get one each;
    # a single extra pipeline step on single-TC v5e/v6e).
    key = jax.random.PRNGKey(0)
    key_x, key_p = jax.random.split(key)

    N, input_feat, latent_feat, output_feat = 512, 16, 32, 8
    x = jax.random.normal(key_x, (N, input_feat), jnp.float32)
    params = init_mlp_params(key_p, input_feat, output_feat, latent_feat,
                             n_layers=3)

    out = jax.block_until_ready(mlp_pallas(x, params))
    ref = mlp_reference(x, params)

    assert out.shape == (N, output_feat)
    # bf16 operands with f32 accumulation: loosened tolerance vs f32 reference.
    assert jnp.allclose(out, ref, atol=3e-2, rtol=3e-2), "mismatch vs reference"

    print("KERNEL_OK")
</pallas_src>

<mosaic_0001>
module attributes {stable_mosaic.version = 11 : i64} {
  func.func @_mlp_kernel(%arg0: i32, %arg1: memref<16x256xbf16, #tpu.memory_space<vmem>>, %arg2: memref<32x16xbf16, #tpu.memory_space<vmem>>, %arg3: memref<32x1xf32, #tpu.memory_space<vmem>>, %arg4: memref<32x32xbf16, #tpu.memory_space<vmem>>, %arg5: memref<32x1xf32, #tpu.memory_space<vmem>>, %arg6: memref<8x32xbf16, #tpu.memory_space<vmem>>, %arg7: memref<8x1xf32, #tpu.memory_space<vmem>>, %arg8: memref<8x256xf32, #tpu.memory_space<vmem>>) attributes {dimension_semantics = [#tpu.dimension_semantics<parallel>], iteration_bounds = array<i64: 2>, scalar_prefetch = 0 : i64, scratch_operands = 0 : i64, tpu.core_type = #tpu.core_type<tc>, window_params = [{transform_indices = @transform_0, window_bounds = array<i64: 16, 256>}, {pipeline_mode = #tpu.pipeline_mode<synchronous>, transform_indices = @transform_1, window_bounds = array<i64: 32, 16>}, {pipeline_mode = #tpu.pipeline_mode<synchronous>, transform_indices = @transform_2, window_bounds = array<i64: 32, 1>}, {pipeline_mode = #tpu.pipeline_mode<synchronous>, transform_indices = @transform_3, window_bounds = array<i64: 32, 32>}, {pipeline_mode = #tpu.pipeline_mode<synchronous>, transform_indices = @transform_4, window_bounds = array<i64: 32, 1>}, {pipeline_mode = #tpu.pipeline_mode<synchronous>, transform_indices = @transform_5, window_bounds = array<i64: 8, 32>}, {pipeline_mode = #tpu.pipeline_mode<synchronous>, transform_indices = @transform_6, window_bounds = array<i64: 8, 1>}, {transform_indices = @transform_7, window_bounds = array<i64: 8, 256>}]} {
    %c0 = arith.constant 0 : index
    %c0_0 = arith.constant 0 : index
    %0 = vector.load %arg1[%c0, %c0_0] : memref<16x256xbf16, #tpu.memory_space<vmem>>, vector<16x256xbf16>
    %c0_1 = arith.constant 0 : index
    %c0_2 = arith.constant 0 : index
    %1 = vector.load %arg2[%c0_1, %c0_2] : memref<32x16xbf16, #tpu.memory_space<vmem>>, vector<32x16xbf16>
    %cst = arith.constant dense<0.000000e+00> : vector<32x256xf32>
    %2 = tpu.matmul %1, %0, %cst {dimension_numbers = #tpu.dot_dimension_numbers<[1], [0], [0], [1], [0, 0, 1, 1], [], []>} : vector<32x16xbf16>, vector<16x256xbf16>, vector<32x256xf32> -> vector<32x256xf32>
    %c0_3 = arith.constant 0 : index
    %c0_4 = arith.constant 0 : index
    %3 = vector.load %arg3[%c0_3, %c0_4] : memref<32x1xf32, #tpu.memory_space<vmem>>, vector<32x1xf32>
    %4 = vector.broadcast %3 : vector<32x1xf32> to vector<32x256xf32>
    %5 = arith.addf %2, %4 : vector<32x256xf32>
    %6 = arith.negf %5 : vector<32x256xf32>
    %7 = math.exp %6 : vector<32x256xf32>
    %cst_5 = arith.constant 1.000000e+00 : f32
    %8 = vector.broadcast %cst_5 : f32 to vector<32x256xf32>
    %9 = arith.addf %8, %7 : vector<32x256xf32>
    %10 = arith.divf %8, %9 : vector<32x256xf32>
    %11 = arith.mulf %5, %10 : vector<32x256xf32>
    %c0_6 = arith.constant 0 : index
    %c0_7 = arith.constant 0 : index
    %12 = vector.load %arg4[%c0_6, %c0_7] : memref<32x32xbf16, #tpu.memory_space<vmem>>, vector<32x32xbf16>
    %13 = arith.truncf %11 : vector<32x256xf32> to vector<32x256xbf16>
    %cst_8 = arith.constant dense<0.000000e+00> : vector<32x256xf32>
    %14 = tpu.matmul %12, %13, %cst_8 {dimension_numbers = #tpu.dot_dimension_numbers<[1], [0], [0], [1], [0, 0, 1, 1], [], []>} : vector<32x32xbf16>, vector<32x256xbf16>, vector<32x256xf32> -> vector<32x256xf32>
    %c0_9 = arith.constant 0 : index
    %c0_10 = arith.constant 0 : index
    %15 = vector.load %arg5[%c0_9, %c0_10] : memref<32x1xf32, #tpu.memory_space<vmem>>, vector<32x1xf32>
    %16 = vector.broadcast %15 : vector<32x1xf32> to vector<32x256xf32>
    %17 = arith.addf %14, %16 : vector<32x256xf32>
    %18 = arith.negf %17 : vector<32x256xf32>
    %19 = math.exp %18 : vector<32x256xf32>
    %cst_11 = arith.constant 1.000000e+00 : f32
    %20 = vector.broadcast %cst_11 : f32 to vector<32x256xf32>
    %21 = arith.addf %20, %19 : vector<32x256xf32>
    %22 = arith.divf %20, %21 : vector<32x256xf32>
    %23 = arith.mulf %17, %22 : vector<32x256xf32>
    %c0_12 = arith.constant 0 : index
    %c0_13 = arith.constant 0 : index
    %24 = vector.load %arg6[%c0_12, %c0_13] : memref<8x32xbf16, #tpu.memory_space<vmem>>, vector<8x32xbf16>
    %25 = arith.truncf %23 : vector<32x256xf32> to vector<32x256xbf16>
    %cst_14 = arith.constant dense<0.000000e+00> : vector<8x256xf32>
    %26 = tpu.matmul %24, %25, %cst_14 {dimension_numbers = #tpu.dot_dimension_numbers<[1], [0], [0], [1], [0, 0, 1, 1], [], []>} : vector<8x32xbf16>, vector<32x256xbf16>, vector<8x256xf32> -> vector<8x256xf32>
    %c0_15 = arith.constant 0 : index
    %c0_16 = arith.constant 0 : index
    %27 = vector.load %arg7[%c0_15, %c0_16] : memref<8x1xf32, #tpu.memory_space<vmem>>, vector<8x1xf32>
    %28 = vector.broadcast %27 : vector<8x1xf32> to vector<8x256xf32>
    %29 = arith.addf %26, %28 : vector<8x256xf32>
    %c0_17 = arith.constant 0 : index
    %c0_18 = arith.constant 0 : index
    %30 = vector.load %arg8[%c0_17, %c0_18] : memref<8x256xf32, #tpu.memory_space<vmem>>, vector<8x256xf32>
    tpu.vector_store %arg8[%c0_17, %c0_18], %29 {strides = array<i32>} : memref<8x256xf32, #tpu.memory_space<vmem>>, vector<8x256xf32>,
    return
  }
  func.func @transform_0(%arg0: i32) -> (i32, i32) {
    %c0_i32 = arith.constant 0 : i32
    %c0_i32_0 = arith.constant 0 : i32
    return %c0_i32, %arg0 : i32, i32
  }
  func.func @transform_1(%arg0: i32) -> (i32, i32) {
    %c0_i32 = arith.constant 0 : i32
    %c0_i32_0 = arith.constant 0 : i32
    %c0_i32_1 = arith.constant 0 : i32
    return %c0_i32, %c0_i32_0 : i32, i32
  }
  func.func @transform_2(%arg0: i32) -> (i32, i32) {
    %c0_i32 = arith.constant 0 : i32
    %c0_i32_0 = arith.constant 0 : i32
    %c0_i32_1 = arith.constant 0 : i32
    return %c0_i32, %c0_i32_0 : i32, i32
  }
  func.func @transform_3(%arg0: i32) -> (i32, i32) {
    %c0_i32 = arith.constant 0 : i32
    %c0_i32_0 = arith.constant 0 : i32
    %c0_i32_1 = arith.constant 0 : i32
    return %c0_i32, %c0_i32_0 : i32, i32
  }
  func.func @transform_4(%arg0: i32) -> (i32, i32) {
    %c0_i32 = arith.constant 0 : i32
    %c0_i32_0 = arith.constant 0 : i32
    %c0_i32_1 = arith.constant 0 : i32
    return %c0_i32, %c0_i32_0 : i32, i32
  }
  func.func @transform_5(%arg0: i32) -> (i32, i32) {
    %c0_i32 = arith.constant 0 : i32
    %c0_i32_0 = arith.constant 0 : i32
    %c0_i32_1 = arith.constant 0 : i32
    return %c0_i32, %c0_i32_0 : i32, i32
  }
  func.func @transform_6(%arg0: i32) -> (i32, i32) {
    %c0_i32 = arith.constant 0 : i32
    %c0_i32_0 = arith.constant 0 : i32
    %c0_i32_1 = arith.constant 0 : i32
    return %c0_i32, %c0_i32_0 : i32, i32
  }
  func.func @transform_7(%arg0: i32) -> (i32, i32) {
    %c0_i32 = arith.constant 0 : i32
    %c0_i32_0 = arith.constant 0 : i32
    return %c0_i32, %arg0 : i32, i32
  }
}

module attributes {stable_mosaic.version = 11 : i64} {
  func.func @_mlp_kernel(%arg0: i32, %arg1: memref<16x256xbf16, #tpu.memory_space<vmem>>, %arg2: memref<32x16xbf16, #tpu.memory_space<vmem>>, %arg3: memref<32x1xf32, #tpu.memory_space<vmem>>, %arg4: memref<32x32xbf16, #tpu.memory_space<vmem>>, %arg5: memref<32x1xf32, #tpu.memory_space<vmem>>, %arg6: memref<8x32xbf16, #tpu.memory_space<vmem>>, %arg7: memref<8x1xf32, #tpu.memory_space<vmem>>, %arg8: memref<8x256xf32, #tpu.memory_space<vmem>>) attributes {dimension_semantics = [#tpu.dimension_semantics<parallel>], iteration_bounds = array<i64: 2>, scalar_prefetch = 0 : i64, scratch_operands = 0 : i64, tpu.core_type = #tpu.core_type<tc>, window_params = [{transform_indices = @transform_0, window_bounds = array<i64: 16, 256>}, {pipeline_mode = #tpu.pipeline_mode<synchronous>, transform_indices = @transform_1, window_bounds = array<i64: 32, 16>}, {pipeline_mode = #tpu.pipeline_mode<synchronous>, transform_indices = @transform_2, window_bounds = array<i64: 32, 1>}, {pipeline_mode = #tpu.pipeline_mode<synchronous>, transform_indices = @transform_3, window_bounds = array<i64: 32, 32>}, {pipeline_mode = #tpu.pipeline_mode<synchronous>, transform_indices = @transform_4, window_bounds = array<i64: 32, 1>}, {pipeline_mode = #tpu.pipeline_mode<synchronous>, transform_indices = @transform_5, window_bounds = array<i64: 8, 32>}, {pipeline_mode = #tpu.pipeline_mode<synchronous>, transform_indices = @transform_6, window_bounds = array<i64: 8, 1>}, {transform_indices = @transform_7, window_bounds = array<i64: 8, 256>}]} {
    %c0 = arith.constant 0 : index
    %c0_0 = arith.constant 0 : index
    %0 = vector.load %arg1[%c0, %c0_0] : memref<16x256xbf16, #tpu.memory_space<vmem>>, vector<16x256xbf16>
    %c0_1 = arith.constant 0 : index
    %c0_2 = arith.constant 0 : index
    %1 = vector.load %arg2[%c0_1, %c0_2] : memref<32x16xbf16, #tpu.memory_space<vmem>>, vector<32x16xbf16>
    %cst = arith.constant dense<0.000000e+00> : vector<32x256xf32>
    %2 = tpu.matmul %1, %0, %cst {dimension_numbers = #tpu.dot_dimension_numbers<[1], [0], [0], [1], [0, 0, 1, 1], [], []>} : vector<32x16xbf16>, vector<16x256xbf16>, vector<32x256xf32> -> vector<32x256xf32>
    %c0_3 = arith.constant 0 : index
    %c0_4 = arith.constant 0 : index
    %3 = vector.load %arg3[%c0_3, %c0_4] : memref<32x1xf32, #tpu.memory_space<vmem>>, vector<32x1xf32>
    %4 = vector.broadcast %3 : vector<32x1xf32> to vector<32x256xf32>
    %5 = arith.addf %2, %4 : vector<32x256xf32>
    %6 = arith.negf %5 : vector<32x256xf32>
    %7 = math.exp %6 : vector<32x256xf32>
    %cst_5 = arith.constant 1.000000e+00 : f32
    %8 = vector.broadcast %cst_5 : f32 to vector<32x256xf32>
    %9 = arith.addf %8, %7 : vector<32x256xf32>
    %10 = arith.divf %8, %9 : vector<32x256xf32>
    %11 = arith.mulf %5, %10 : vector<32x256xf32>
    %c0_6 = arith.constant 0 : index
    %c0_7 = arith.constant 0 : index
    %12 = vector.load %arg4[%c0_6, %c0_7] : memref<32x32xbf16, #tpu.memory_space<vmem>>, vector<32x32xbf16>
    %13 = arith.truncf %11 : vector<32x256xf32> to vector<32x256xbf16>
    %cst_8 = arith.constant dense<0.000000e+00> : vector<32x256xf32>
    %14 = tpu.matmul %12, %13, %cst_8 {dimension_numbers = #tpu.dot_dimension_numbers<[1], [0], [0], [1], [0, 0, 1, 1], [], []>} : vector<32x32xbf16>, vector<32x256xbf16>, vector<32x256xf32> -> vector<32x256xf32>
    %c0_9 = arith.constant 0 : index
    %c0_10 = arith.constant 0 : index
    %15 = vector.load %arg5[%c0_9, %c0_10] : memref<32x1xf32, #tpu.memory_space<vmem>>, vector<32x1xf32>
    %16 = vector.broadcast %15 : vector<32x1xf32> to vector<32x256xf32>
    %17 = arith.addf %14, %16 : vector<32x256xf32>
    %18 = arith.negf %17 : vector<32x256xf32>
    %19 = math.exp %18 : vector<32x256xf32>
    %cst_11 = arith.constant 1.000000e+00 : f32
    %20 = vector.broadcast %cst_11 : f32 to vector<32x256xf32>
    %21 = arith.addf %20, %19 : vector<32x256xf32>
    %22 = arith.divf %20, %21 : vector<32x256xf32>
    %23 = arith.mulf %17, %22 : vector<32x256xf32>
    %c0_12 = arith.constant 0 : index
    %c0_13 = arith.constant 0 : index
    %24 = vector.load %arg6[%c0_12, %c0_13] : memref<8x32xbf16, #tpu.memory_space<vmem>>, vector<8x32xbf16>
    %25 = arith.truncf %23 : vector<32x256xf32> to vector<32x256xbf16>
    %cst_14 = arith.constant dense<0.000000e+00> : vector<8x256xf32>
    %26 = tpu.matmul %24, %25, %cst_14 {dimension_numbers = #tpu.dot_dimension_numbers<[1], [0], [0], [1], [0, 0, 1, 1], [], []>} : vector<8x32xbf16>, vector<32x256xbf16>, vector<8x256xf32> -> vector<8x256xf32>
    %c0_15 = arith.constant 0 : index
    %c0_16 = arith.constant 0 : index
    %27 = vector.load %arg7[%c0_15, %c0_16] : memref<8x1xf32, #tpu.memory_space<vmem>>, vector<8x1xf32>
    %28 = vector.broadcast %27 : vector<8x1xf32> to vector<8x256xf32>
    %29 = arith.addf %26, %28 : vector<8x256xf32>
    %c0_17 = arith.constant 0 : index
    %c0_18 = arith.constant 0 : index
    %30 = vector.load %arg8[%c0_17, %c0_18] : memref<8x256xf32, #tpu.memory_space<vmem>>, vector<8x256xf32>
    tpu.vector_store %arg8[%c0_17, %c0_18], %29 {strides = array<i32>} : memref<8x256xf32, #tpu.memory_space<vmem>>, vector<8x256xf32>,
    return
  }
  func.func @transform_0(%arg0: i32) -> (i32, i32) {
    %c0_i32 = arith.constant 0 : i32
    %c0_i32_0 = arith.constant 0 : i32
    return %c0_i32, %arg0 : i32, i32
  }
  func.func @transform_1(%arg0: i32) -> (i32, i32) {
    %c0_i32 = arith.constant 0 : i32
    %c0_i32_0 = arith.constant 0 : i32
    %c0_i32_1 = arith.constant 0 : i32
    return %c0_i32, %c0_i32_0 : i32, i32
  }
  func.func @transform_2(%arg0: i32) -> (i32, i32) {
    %c0_i32 = arith.constant 0 : i32
    %c0_i32_0 = arith.constant 0 : i32
    %c0_i32_1 = arith.constant 0 : i32
    return %c0_i32, %c0_i32_0 : i32, i32
  }
  func.func @transform_3(%arg0: i32) -> (i32, i32) {
    %c0_i32 = arith.constant 0 : i32
    %c0_i32_0 = arith.constant 0 : i32
    %c0_i32_1 = arith.constant 0 : i32
    return %c0_i32, %c0_i32_0 : i32, i32
  }
  func.func @transform_4(%arg0: i32) -> (i32, i32) {
    %c0_i32 = arith.constant 0 : i32
    %c0_i32_0 = arith.constant 0 : i32
    %c0_i32_1 = arith.constant 0 : i32
    return %c0_i32, %c0_i32_0 : i32, i32
  }
  func.func @transform_5(%arg0: i32) -> (i32, i32) {
    %c0_i32 = arith.constant 0 : i32
    %c0_i32_0 = arith.constant 0 : i32
    %c0_i32_1 = arith.constant 0 : i32
    return %c0_i32, %c0_i32_0 : i32, i32
  }
  func.func @transform_6(%arg0: i32) -> (i32, i32) {
    %c0_i32 = arith.constant 0 : i32
    %c0_i32_0 = arith.constant 0 : i32
    %c0_i32_1 = arith.constant 0 : i32
    return %c0_i32, %c0_i32_0 : i32, i32
  }
  func.func @transform_7(%arg0: i32) -> (i32, i32) {
    %c0_i32 = arith.constant 0 : i32
    %c0_i32_0 = arith.constant 0 : i32
    return %c0_i32, %arg0 : i32, i32
  }
}

</mosaic_0001>

<bundles_post_ra>
// kernel: tpu_custom_call.1
= control target key start
LH: loop header
LB: loop body
LE: loop exit
PB: predicated region body
PF: predicated region fallthrough
CT: control target
= control target key end

     0   :  { %12 = vsyncpa [#allocation4], 0  ;;  %s1207_s0 = inlined_call_operand.vmem [shape: bf16[16,512], index: 0, kind: input, shape index: {}]   ;;  %s1208_s1 = inlined_call_operand.vmem [shape: bf16[32,16], index: 1, kind: input, shape index: {}]   ;;  %s1209_s2 = inlined_call_operand.vmem [shape: f32[32,1], index: 2, kind: input, shape index: {}]   ;;  %s1210_s3 = inlined_call_operand.vmem [shape: bf16[32,32], index: 3, kind: input, shape index: {}]   ;;  %s1211_s4 = inlined_call_operand.vmem [shape: f32[32,1], index: 4, kind: input, shape index: {}]   ;;  %s1212_s5 = inlined_call_operand.vmem [shape: bf16[8,32], index: 5, kind: input, shape index: {}]   ;;  %s1213_s6 = inlined_call_operand.vmem [shape: f32[8,1], index: 6, kind: input, shape index: {}]   ;;  %s1214_s7 = inlined_call_operand.hbm [shape: f32[8,512], index: 7, kind: output, shape index: {}]  }
   0x1   :  { %14 = vsyncpa [#allocation4 + $0x1], 0  ;;  %s1042_s24 = smov 0   ;;  %s1044_s25 = smov 0  }
   0x2   :  { %s1046_s26 = smov 0   ;;  %s1048_s27 = smov 0  }
   0x3 LB: > { %s779_s28 = sadd.s32 4294967295, %s998_s27   ;;  %s780_s29 = sadd.s32 4294967294, %s998_s27   ;;  %s998_s27 = sphi %s1048_s27, %s1220_s27   ;;  %s994_s26 = sphi %s1046_s26, %s1219_s26   ;;  %s990_s25 = sphi %s1044_s25, %s1218_s25   ;;  %s986_s24 = sphi %s1042_s24, %s1217_s24  }
   0x4   : > { %s1065_s30 = sadd.s32 1, %s998_s27   ;;  %s27_s8 = sadd.s32 1, %s994_s26 }
   0x5   : > { %s24_s9 = ssub.s32 %s998_s27, %s1065_s30  ;;  %p34_p0 = scmp.ne.s32.totalorder %s994_s26, %s990_s25 }
   0x6   : > { %p25_p1 = scmp.eq.s32.totalorder %s24_s9, 0  ;;  %p35_p2 = scmp.eq.s32.totalorder %s998_s27, 0 }
   0x7   : > { %p190_p3 = scmp.eq.s32.totalorder %s779_s28, 1  ;;  %p195_p4 = scmp.ne.s32.totalorder %s990_s25, %s986_s24 }
   0x8   : > { %s1078_s10 = scalar_select %p25_p1, %s994_s26, %s27_s8  }
   0x9   : > { %p36_p5 = por %p35_p2, %p34_p0  ;;  %p1080_p6 = por %p190_p3, %p34_p0 }
   0xa   : > { %p196_p7 = scmp.eq.s32.totalorder %s780_s29, 1  ;;  %p782_p9 = scmp.ge.s32.totalorder %s998_s27, 2 }
   0xc   : > { %p1084_p8 = por %p196_p7, %p195_p4  ;;  %230 = sbr.rel (%p782_p9) target bundleno = 26 (0x1a), region = 40 }
  0x13   : > { %233 = sbr.rel (!%p36_p5) target bundleno = 26 (0x1a), region = 44  ;;  %s235_s13 = sand.u32 (%p36_p5), 1, %s994_s26  }
  0x14   : > { %s821_s14 = sshll.u32 (%p36_p5), %s998_s27, 3  ;;  %s783_s15 = sshll.u32 (%p36_p5), %s235_s13, 4 }
  0x15   : > { %s240_s18 = scalar_lea.vmem (%p36_p5), %s1207_s0, %s821_s14  ;;  %s237_s19 = scalar_lea.vmem (%p36_p5), [#allocation2], %s783_s15 }
  0x16   : > { %v270_v0 = vld [vmem:[%s240_s18] sm:$0xff] (%p36_p5)  ;;  %v272_v1 = vld [vmem:[%s240_s18 + $0x10] sm:$0xff] (%p36_p5) }
  0x17   : > { %271 = vst [vmem:[%s237_s19] sm:$0xff] (%p36_p5), %v270_v0  ;;  %273 = vst [vmem:[%s237_s19 + $0x8] sm:$0xff] (%p36_p5), %v272_v1 }
  0x1a PF: > { %p786_p10 = scmp.ge.s32.totalorder %s998_s27, 1  ;;  %p278_p11 = scmp.lt.s32.totalorder %s998_s27, 3 }
  0x1c   : > { %p279_p12 = pnand %p786_p10, %p278_p11 }
  0x1d   : > { %s285_s20 = sand.u32 (!%p279_p12), 1, %s990_s25   ;;  %v1000_v2 = vmov (!%p279_p12), 0   ;;  %v325_v3 = vld [vmem:[%s1209_s2] sm:$0xff] (!%p279_p12)  ;;  %v326_v6 = vld [vmem:[%s1209_s2 + $0x8] sm:$0xff] (!%p279_p12)  ;;  %v327_v7 = vld [vmem:[%s1209_s2 + $0x10] sm:$0xff] (!%p279_p12)  ;;  %vm369_vm0 = vcmask (!%p279_p12), 130048  }
  0x1e   : > { %282 = sbr.rel (%p279_p12) target bundleno = 784 (0x310), region = 82  ;;  %s1101_s21 = sshll.u32 (!%p279_p12), %s285_s20, 4  ;;  %408 = vmatprep.mubr.bf16.mxu0 (!%p279_p12), %v1000_v2  ;;  %863 = vset.pattern.permute.xlu0 (!%p279_p12), %v1000_v2  ;;  %v868_v8 = vld [vmem:[%s1208_s1] sm:$0xff] (!%p279_p12)   ;;  %v328_v9 = vld [vmem:[%s1209_s2 + $0x18] sm:$0xff] (!%p279_p12)  ;;  %v494_v11 = vld [vmem:[%s1211_s4 + $0x8] sm:$0xff] (!%p279_p12)  ;;  %vm527_vm1 = vcmask (!%p279_p12), 261120  }
  0x1f   : > { %864 = vset.pattern.permute.xlu1 (!%p279_p12), %v1000_v2  ;;  %566 = vmatprep.mubr.bf16.mxu1 (!%p279_p12), %v1000_v2  ;;  %s287_s29 = scalar_lea.vmem (!%p279_p12), [#allocation2], %s1101_s21  ;;  %v493_v10 = vld [vmem:[%s1211_s4] sm:$0xff] (!%p279_p12)  ;;  %v495_v12 = vld [vmem:[%s1211_s4 + $0x10] sm:$0xff] (!%p279_p12)  ;;  %v869_v13 = vld [vmem:[%s1208_s1 + $0x8] sm:$0xff] (!%p279_p12)   ;;  %s822_s13 = sshll.u32 (!%p279_p12), %s779_s28, 8 }
  0x20   : > { %v865_v4 = vld [vmem:[%s287_s29 + $0x4] ss:$8 sps:$4 sm:$0xff] (!%p279_p12)   ;;  %331 = vperm.xlu0 (!%p279_p12), %863, %v325_v3   ;;  %v867_v5 = vld [vmem:[%s287_s29] ss:$8 sps:$4 sm:$0xff] (!%p279_p12)   ;;  %341 = vperm.xlu1 (!%p279_p12), %864, %v327_v7   ;;  %s315_s14 = scalar_lea.vmem (!%p279_p12), [#allocation3], %s1101_s21  ;;  %s1162_s18 = scalar_lea.hbm (!%p279_p12), %s1214_s7, %s822_s13 }
  0x21   : > { %376 = vmatprep.subr.bf16.mxu0 (!%p279_p12), %v865_v4  ;;  %v496_v14 = vld [vmem:[%s1211_s4 + $0x18] sm:$0xff] (!%p279_p12)  ;;  %v648_v15 = vld [vmem:[%s1213_s6] sm:$0xff] (!%p279_p12)  ;;  %s715_s15 = sshll.u32 (!%p279_p12), %s315_s14, 4  ;;  %s701_s28 = scalar_lea.sflag (!%p279_p12), [#allocation4], %s285_s20  ;;  %s1164_s15 = int_to_ptr.vmem [resolvable:$true] %s715_s15 }
  0x22   : > { %377 = vmatpush1.bf16.msra.mxu0 (!%p279_p12), %v867_v5  ;;  %s936_s21 = scalar_lea.vmem (!%p279_p12), %s1164_s15, 256  ;;  %s1001_s19 = smov (!%p279_p12), [#allocation3]  }
  0x23   : > { %p937_p13 = scmp.ne.s32.totalorder (!%p279_p12), %s1164_s15, %s936_s21  ;;  %s940_s22 = sshll.u32 (!%p279_p12), %s1001_s19, 4  ;;  %s941_s22 = int_to_ptr.vmem [resolvable:$false] %s940_s22 }
  0x24   : > { %336 = vperm.xlu0 (!%p279_p12), %863, %v326_v6   ;;  %346 = vperm.xlu1 (!%p279_p12), %864, %v328_v9   ;;  %s942_s23 = scalar_lea.vmem (!%p279_p12), %s941_s22, 512  ;;  %p943_p2 = scmp.lt.s32.totalorder (!%p279_p12), %s1164_s15, %s941_s22 }
  0x25   : > { %793 = vmatmul.mubr.msk.bf16.vlgmr.msra.gmra.mrb[0].mxu0 %vm369_vm0, %v868_v8  ;;  %p938_p0 = pnand %p937_p13, %p1080_p6  ;;  %p944_p3 = scmp.lt.s32.totalorder %s942_s23, %s936_s21 }
  0x26   : > { %418 = vmatprep.mubr.bf16.mxu0 %v1000_v2 }
  0x27   : > { %p939_p1 = pneg %p938_p0  ;;  %p945_p4 = por %p944_p3, %p943_p2 }
  0x28   : > { %499 = vperm.xlu0 %863, %v493_v10   ;;  %504 = vperm.xlu1 %864, %v494_v11  }
  0x29   : > { %p946_p5 = pnand %p945_p4, %p939_p1 }
  0x2c   : > { %509 = vperm.xlu0 %863, %v495_v12   ;;  %514 = vperm.xlu1 %864, %v496_v14  }
  0x2d   : > { %794 = vmatmul.mubr.msk.bf16.gmra.mrb[4].mxu0 %vm369_vm0, %v869_v13 }
  0x2e   : > { %689 = vmatprep.mubr.bf16.mxu0 %v1000_v2 }
  0x30   : > { %651 = vperm.xlu0 %863, %v648_v15  }
  0x9f   : > { %v332_v16 = vpop.permute.xlu0 %331  ;;  %v342_v26 = vpop.permute.xlu1 %341 }
  0xa3   : > { %v337_v20 = vpop.permute.xlu0 %336  ;;  %v347_v34 = vpop.permute.xlu1 %346 }
  0xf8   : > { %v410_v17 = vpop.f32.mrb[0].mxu0 }
  0xf9   : > { %v411_v18 = vadd.f32 %v410_v17, %v332_v16  ;;  %v412_v19 = vpop.f32.mrb[1].mxu0  ;;  %v870_v17 = vld [vmem:[%s1210_s3] sm:$0xff]  }
  0xfa   : > { %v413_v21 = vadd.f32 %v412_v19, %v332_v16  ;;  %v414_v22 = vpop.f32.mrb[2].mxu0  ;;  %v500_v19 = vpop.permute.xlu0 %499 }
  0xfb   : > { %v795_v23 = vmul.f32 -1.442695, %v411_v18  ;;  %v415_v24 = vadd.f32 %v414_v22, %v337_v20  ;;  %v416_v25 = vpop.f32.mrb[3].mxu0 }
  0xfc   : > { %v796_v27 = vmul.f32 -1.442695, %v413_v21  ;;  %v417_v28 = vadd.f32 %v416_v25, %v337_v20 }
  0xfd   : > { %872 = vpow2.f32 %v795_v23  ;;  %v797_v29 = vmul.f32 -1.442695, %v415_v24  ;;  %v505_v23 = vpop.permute.xlu1 %504 }
  0xfe   : > { %874 = vpow2.f32 %v796_v27  ;;  %v798_v30 = vmul.f32 -1.442695, %v417_v28 }
  0xff   : > { %876 = vpow2.f32 %v797_v29 }
 0x100   : > { %878 = vpow2.f32 %v798_v30  ;;  %v420_v31 = vpop.f32.mrb[4].mxu0 }
 0x101   : > { %v421_v32 = vadd.f32 %v420_v31, %v342_v26  ;;  %v422_v33 = vpop.f32.mrb[5].mxu0 }
 0x102   : > { %v423_v35 = vadd.f32 %v422_v33, %v342_v26  ;;  %v424_v36 = vpop.f32.mrb[6].mxu0 }
 0x103   : > { %v799_v37 = vmul.f32 -1.442695, %v421_v32  ;;  %v425_v38 = vadd.f32 %v424_v36, %v347_v34  ;;  %v426_v39 = vpop.f32.mrb[7].mxu0  ;;  %v515_v36 = vpop.permute.xlu1 %514 }
 0x104   : > { %v800_v40 = vmul.f32 -1.442695, %v423_v35  ;;  %v427_v41 = vadd.f32 %v426_v39, %v347_v34 }
 0x105   : > { %880 = vpow2.f32 %v799_v37  ;;  %v801_v42 = vmul.f32 -1.442695, %v425_v38 }
 0x106   : > { %882 = vpow2.f32 %v800_v40  ;;  %v802_v43 = vmul.f32 -1.442695, %v427_v41 }
 0x107   : > { %v873_v44 = vpop.eup %872  ;;  %884 = vpow2.f32 %v801_v42 }
 0x108   : > { %v875_v45 = vpop.eup %874  ;;  %v453_v46 = vadd.f32 1.0, %v873_v44  ;;  %886 = vpow2.f32 %v802_v43 }
 0x109   : > { %v877_v47 = vpop.eup %876  ;;  %v454_v48 = vadd.f32 1.0, %v875_v45 }
 0x10a   : > { %v879_v49 = vpop.eup %878  ;;  %888 = vrcp.f32 %v453_v46  ;;  %v455_v50 = vadd.f32 1.0, %v877_v47 }
 0x10b   : > { %890 = vrcp.f32 %v454_v48  ;;  %v456_v51 = vadd.f32 1.0, %v879_v49 }
 0x10c   : > { %892 = vrcp.f32 %v455_v50 }
 0x10d   : > { %894 = vrcp.f32 %v456_v51 }
 0x10f   : > { %v881_v52 = vpop.eup %880 }
 0x110   : > { %v883_v53 = vpop.eup %882  ;;  %v457_v54 = vadd.f32 1.0, %v881_v52 }
 0x111   : > { %v885_v55 = vpop.eup %884  ;;  %v458_v56 = vadd.f32 1.0, %v883_v53 }
 0x112   : > { %v887_v57 = vpop.eup %886  ;;  %896 = vrcp.f32 %v457_v54  ;;  %v459_v58 = vadd.f32 1.0, %v885_v55 }
 0x113   : > { %898 = vrcp.f32 %v458_v56  ;;  %v460_v59 = vadd.f32 1.0, %v887_v57 }
 0x114   : > { %v889_v60 = vpop.eup %888  ;;  %900 = vrcp.f32 %v459_v58 }
 0x115   : > { %v891_v61 = vpop.eup %890  ;;  %902 = vrcp.f32 %v460_v59  ;;  %v477_v0 = vmul.f32 %v889_v60, %v411_v18  ;;  %v871_v18 = vld [vmem:[%s1210_s3 + $0x8] sm:$0xff]  }
 0x116   : > { %v893_v62 = vpop.eup %892  ;;  %v478_v3 = vmul.f32 %v891_v61, %v413_v21 }
 0x117   : > { %v895_v63 = vpop.eup %894  ;;  %v479_v1 = vmul.f32 %v893_v62, %v415_v24 }
 0x118   : > { %v480_v4 = vmul.f32 %v895_v63, %v417_v28 }
 0x119   : > { %v489_v5 = vpack.c.bf16 %v479_v1, %v477_v0 }
 0x11a   : > { %v490_v6 = vpack.c.bf16 %v480_v4, %v478_v3 }
 0x11c   : > { %v897_v7 = vpop.eup %896  ;;  %534 = vmatprep.subr.bf16.mxu1 %v490_v6 }
 0x11d   : > { %v899_v8 = vpop.eup %898  ;;  %535 = vmatpush1.bf16.msra.mxu1 %v489_v5  ;;  %v481_v11 = vmul.f32 %v897_v7, %v421_v32  ;;  %v510_v32 = vpop.permute.xlu0 %509 }
 0x11e   : > { %v901_v9 = vpop.eup %900  ;;  %v482_v13 = vmul.f32 %v899_v8, %v423_v35 }
 0x11f   : > { %v903_v10 = vpop.eup %902  ;;  %v483_v12 = vmul.f32 %v901_v9, %v425_v38 }
 0x120   : > { %v484_v14 = vmul.f32 %v903_v10, %v427_v41 }
 0x121   : > { %v491_v15 = vpack.c.bf16 %v483_v12, %v481_v11 }
 0x122   : > { %v492_v16 = vpack.c.bf16 %v484_v14, %v482_v13 }
 0x124   : > { %536 = vmatprep.subr.bf16.mxu1 %v492_v16 }
 0x125   : > { %537 = vmatpush1.bf16.msra.mxu1 %v491_v15 }
 0x128   : > { %805 = vmatmul.mubr.msk.bf16.vlgmr.msra.gmra.mrb[0].mxu1 %vm527_vm1, %v870_v17 }
 0x129   : > { %576 = vmatprep.mubr.bf16.mxu1 %v1000_v2 }
 0x130   : > { %806 = vmatmul.mubr.msk.bf16.gmra.mrb[4].mxu1 %vm527_vm1, %v871_v18 }
 0x1fb   : > { %v568_v20 = vpop.f32.mrb[0].mxu1 }
 0x1fc   : > { %v569_v21 = vadd.f32 %v568_v20, %v500_v19  ;;  %v570_v22 = vpop.f32.mrb[1].mxu1  ;;  %v652_v20 = vpop.permute.xlu0 %651 }
 0x1fd   : > { %v571_v24 = vadd.f32 %v570_v22, %v500_v19  ;;  %v572_v25 = vpop.f32.mrb[2].mxu1  ;;  %v643_v19 = vld [vmem:[%s1212_s5] sm:$0xf] }
 0x1fe   : > { %v807_v26 = vmul.f32 -1.442695, %v569_v21  ;;  %v573_v27 = vadd.f32 %v572_v25, %v505_v23  ;;  %v574_v28 = vpop.f32.mrb[3].mxu1 }
 0x1ff   : > { %v808_v29 = vmul.f32 -1.442695, %v571_v24  ;;  %v575_v30 = vadd.f32 %v574_v28, %v505_v23 }
 0x200   : > { %904 = vpow2.f32 %v807_v26  ;;  %v809_v2 = vmul.f32 -1.442695, %v573_v27 }
 0x201   : > { %906 = vpow2.f32 %v808_v29  ;;  %v810_v31 = vmul.f32 -1.442695, %v575_v30 }
 0x202   : > { %908 = vpow2.f32 %v809_v2 }
 0x203   : > { %910 = vpow2.f32 %v810_v31  ;;  %v578_v33 = vpop.f32.mrb[4].mxu1 }
 0x204   : > { %v579_v34 = vadd.f32 %v578_v33, %v510_v32  ;;  %v580_v35 = vpop.f32.mrb[5].mxu1 }
 0x205   : > { %v581_v37 = vadd.f32 %v580_v35, %v510_v32  ;;  %v582_v38 = vpop.f32.mrb[6].mxu1 }
 0x206   : > { %v811_v39 = vmul.f32 -1.442695, %v579_v34  ;;  %v583_v40 = vadd.f32 %v582_v38, %v515_v36  ;;  %v584_v41 = vpop.f32.mrb[7].mxu1 }
 0x207   : > { %v812_v42 = vmul.f32 -1.442695, %v581_v37  ;;  %v585_v43 = vadd.f32 %v584_v41, %v515_v36 }
 0x208   : > { %912 = vpow2.f32 %v811_v39  ;;  %v813_v44 = vmul.f32 -1.442695, %v583_v40 }
 0x209   : > { %914 = vpow2.f32 %v812_v42  ;;  %v814_v45 = vmul.f32 -1.442695, %v585_v43 }
 0x20a   : > { %v905_v46 = vpop.eup %904  ;;  %916 = vpow2.f32 %v813_v44 }
 0x20b   : > { %v907_v47 = vpop.eup %906  ;;  %v611_v48 = vadd.f32 1.0, %v905_v46  ;;  %918 = vpow2.f32 %v814_v45 }
 0x20c   : > { %v909_v49 = vpop.eup %908  ;;  %v612_v50 = vadd.f32 1.0, %v907_v47 }
 0x20d   : > { %v911_v51 = vpop.eup %910  ;;  %920 = vrcp.f32 %v611_v48  ;;  %v613_v52 = vadd.f32 1.0, %v909_v49 }
 0x20e   : > { %922 = vrcp.f32 %v612_v50  ;;  %v614_v53 = vadd.f32 1.0, %v911_v51 }
 0x20f   : > { %924 = vrcp.f32 %v613_v52 }
 0x210   : > { %926 = vrcp.f32 %v614_v53 }
 0x212   : > { %v913_v54 = vpop.eup %912 }
 0x213   : > { %v915_v55 = vpop.eup %914  ;;  %v615_v56 = vadd.f32 1.0, %v913_v54 }
 0x214   : > { %v917_v57 = vpop.eup %916  ;;  %v616_v58 = vadd.f32 1.0, %v915_v55 }
 0x215   : > { %v919_v59 = vpop.eup %918  ;;  %928 = vrcp.f32 %v615_v56  ;;  %v617_v60 = vadd.f32 1.0, %v917_v57 }
 0x216   : > { %930 = vrcp.f32 %v616_v58  ;;  %v618_v61 = vadd.f32 1.0, %v919_v59 }
 0x217   : > { %v921_v62 = vpop.eup %920  ;;  %932 = vrcp.f32 %v617_v60 }
 0x218   : > { %v923_v63 = vpop.eup %922  ;;  %934 = vrcp.f32 %v618_v61  ;;  %v635_v3 = vmul.f32 %v921_v62, %v569_v21 }
 0x219   : > { %v925_v0 = vpop.eup %924  ;;  %v636_v5 = vmul.f32 %v923_v63, %v571_v24 }
 0x21a   : > { %v927_v1 = vpop.eup %926  ;;  %v637_v4 = vmul.f32 %v925_v0, %v573_v27 }
 0x21b   : > { %v638_v6 = vmul.f32 %v927_v1, %v575_v30 }
 0x21c   : > { %v644_v7 = vpack.c.bf16 %v637_v4, %v635_v3 }
 0x21d   : > { %v645_v8 = vpack.c.bf16 %v638_v6, %v636_v5 }
 0x21f   : > { %v929_v9 = vpop.eup %928  ;;  %657 = vmatprep.subr.bf16.mxu0 %v645_v8 }
 0x220   : > { %v931_v10 = vpop.eup %930  ;;  %658 = vmatpush1.bf16.msra.mxu0 %v644_v7  ;;  %v639_v13 = vmul.f32 %v929_v9, %v579_v34 }
 0x221   : > { %v933_v11 = vpop.eup %932  ;;  %v640_v15 = vmul.f32 %v931_v10, %v581_v37 }
 0x222   : > { %v935_v12 = vpop.eup %934  ;;  %v641_v14 = vmul.f32 %v933_v11, %v583_v40 }
 0x223   : > { %v642_v16 = vmul.f32 %v935_v12, %v585_v43 }
 0x224   : > { %v646_v17 = vpack.c.bf16 %v641_v14, %v639_v13 }
 0x225   : > { %v647_v18 = vpack.c.bf16 %v642_v16, %v640_v15 }
 0x227   : > { %659 = vmatprep.subr.bf16.mxu0 %v647_v18 }
 0x228   : > { %660 = vmatpush1.bf16.msra.mxu0 %v646_v17 }
 0x22b   : > { %815 = vmatmul.mubr.msk.bf16.vlgmr.msra.gmra.mrb[8].mxu0 %vm527_vm1, %v643_v19 }
 0x2fe   : > { %v691_v21 = vpop.f32.mrb[8].mxu0 }
 0x2ff   : > { %v692_v22 = vadd.f32 %v691_v21, %v652_v20  ;;  %v693_v23 = vpop.f32.mrb[9].mxu0 }
 0x300   : > { %v694_v24 = vadd.f32 %v693_v23, %v652_v20  ;;  %v695_v25 = vpop.f32.mrb[10].mxu0 }
 0x301   : > { %698 = vst [vmem:[%s315_s14] sm:$0xff] %v692_v22  ;;  %v696_v26 = vpop.f32.mrb[11].mxu0 }
 0x302   : > { %699 = vst [vmem:[%s315_s14 + $0x8] sm:$0xff] %v694_v24 }
 0x303   : > { %949 = shalt.err (!%p946_p5)
}
 0x304   : > { %s950_s20 = scalar_lea.hbm %s1162_s18, 256  ;;  %s954_s9 = scalar_lea.hbm %s1214_s7, 512 }
 0x305   : > { %p951_p7 = scmp.ne.s32.totalorder %s1162_s18, %s950_s20  ;;  %p955_p12 = scmp.lt.u32.totalorder %s1162_s18, %s1214_s7 }
 0x306   : > { %p956_p13 = scmp.lt.u32.totalorder %s954_s9, %s950_s20  ;;  %p958_p1 = scmp.lt.u32.totalorder %s950_s20, %s1162_s18 }
 0x307   : > { %p952_p10 = pnand %p951_p7, %p1080_p6 }
 0x308   : > { %p957_p0 = por %p956_p13, %p955_p12 }
 0x309   : > { %p953_p11 = pneg %p952_p10 }
 0x30a   : > { %p959_p2 = por %p958_p1, %p957_p0 }
 0x30c   : > { %p960_p3 = pnand %p959_p2, %p953_p11 }
 0x30e   : > { %963 = shalt.err (!%p960_p3)
}
 0x30f   : > { %823 = dma.vmem_to_hbm [thread:$0]  (%p1080_p6), %s1164_s15, 256, %s1162_s18, %s701_s28  }
 0x310 PF: > { %s727_s16 = sand.u32 1, %s986_s24   ;;  %p826_p4 = pnand %p782_p9, %p1084_p8 }
 0x311   : > { %s728_s17 = scalar_lea.sflag [#allocation4], %s727_s16 }
 0x312   : > { %981 = dma.done.wait (!%p826_p4), %s728_s17, 256  }
 0x313   : > { %983 = vsyncadd (!%p826_p4), %s728_s17, 4294967040  ;;  %p17_p5 = scmp.ge.s32.totalorder %s1065_s30, 4   ;;  %s1217_s24 = smov %s990_s25 }
 0x314   : > { %s1218_s25 = smov %s994_s26  ;;  %s1219_s26 = smov %s1078_s10 }
 0x315   : > { %s1220_s27 = smov %s1065_s30  ;;  %19 = sbr.rel (!%p17_p5) target bundleno = 3 (0x3), region = 126 }
 0x31c   :  { %733 = vsyncpa [#allocation4], 1 }
 0x31d   :  { %735 = vsyncpa [#allocation4 + $0x1], 1 }

// kernel: tpu_custom_call.1
= control target key start
LH: loop header
LB: loop body
LE: loop exit
PB: predicated region body
PF: predicated region fallthrough
CT: control target
= control target key end

     0   :  { %12 = vsyncpa [#allocation4], 0  ;;  %s1207_s0 = inlined_call_operand.vmem [shape: bf16[16,512], index: 0, kind: input, shape index: {}]   ;;  %s1208_s1 = inlined_call_operand.vmem [shape: bf16[32,16], index: 1, kind: input, shape index: {}]   ;;  %s1209_s2 = inlined_call_operand.vmem [shape: f32[32,1], index: 2, kind: input, shape index: {}]   ;;  %s1210_s3 = inlined_call_operand.vmem [shape: bf16[32,32], index: 3, kind: input, shape index: {}]   ;;  %s1211_s4 = inlined_call_operand.vmem [shape: f32[32,1], index: 4, kind: input, shape index: {}]   ;;  %s1212_s5 = inlined_call_operand.vmem [shape: bf16[8,32], index: 5, kind: input, shape index: {}]   ;;  %s1213_s6 = inlined_call_operand.vmem [shape: f32[8,1], index: 6, kind: input, shape index: {}]   ;;  %s1214_s7 = inlined_call_operand.hbm [shape: f32[8,512], index: 7, kind: output, shape index: {}]  }
   0x1   :  { %14 = vsyncpa [#allocation4 + $0x1], 0  ;;  %s1042_s24 = smov 0   ;;  %s1044_s25 = smov 0  }
   0x2   :  { %s1046_s26 = smov 0   ;;  %s1048_s27 = smov 0  }
   0x3 LB: > { %s779_s28 = sadd.s32 4294967295, %s998_s27   ;;  %s780_s29 = sadd.s32 4294967294, %s998_s27   ;;  %s998_s27 = sphi %s1048_s27, %s1220_s27   ;;  %s994_s26 = sphi %s1046_s26, %s1219_s26   ;;  %s990_s25 = sphi %s1044_s25, %s1218_s25   ;;  %s986_s24 = sphi %s1042_s24, %s1217_s24  }
   0x4   : > { %s1065_s30 = sadd.s32 1, %s998_s27   ;;  %s27_s8 = sadd.s32 1, %s994_s26 }
   0x5   : > { %s24_s9 = ssub.s32 %s998_s27, %s1065_s30  ;;  %p34_p0 = scmp.ne.s32.totalorder %s994_s26, %s990_s25 }
   0x6   : > { %p25_p1 = scmp.eq.s32.totalorder %s24_s9, 0  ;;  %p35_p2 = scmp.eq.s32.totalorder %s998_s27, 0 }
   0x7   : > { %p190_p3 = scmp.eq.s32.totalorder %s779_s28, 1  ;;  %p195_p4 = scmp.ne.s32.totalorder %s990_s25, %s986_s24 }
   0x8   : > { %s1078_s10 = scalar_select %p25_p1, %s994_s26, %s27_s8  }
   0x9   : > { %p36_p5 = por %p35_p2, %p34_p0  ;;  %p1080_p6 = por %p190_p3, %p34_p0 }
   0xa   : > { %p196_p7 = scmp.eq.s32.totalorder %s780_s29, 1  ;;  %p782_p9 = scmp.ge.s32.totalorder %s998_s27, 2 }
   0xc   : > { %p1084_p8 = por %p196_p7, %p195_p4  ;;  %230 = sbr.rel (%p782_p9) target bundleno = 26 (0x1a), region = 40 }
  0x13   : > { %233 = sbr.rel (!%p36_p5) target bundleno = 26 (0x1a), region = 44  ;;  %s235_s13 = sand.u32 (%p36_p5), 1, %s994_s26  }
  0x14   : > { %s821_s14 = sshll.u32 (%p36_p5), %s998_s27, 3  ;;  %s783_s15 = sshll.u32 (%p36_p5), %s235_s13, 4 }
  0x15   : > { %s240_s18 = scalar_lea.vmem (%p36_p5), %s1207_s0, %s821_s14  ;;  %s237_s19 = scalar_lea.vmem (%p36_p5), [#allocation2], %s783_s15 }
  0x16   : > { %v270_v0 = vld [vmem:[%s240_s18] sm:$0xff] (%p36_p5)  ;;  %v272_v1 = vld [vmem:[%s240_s18 + $0x10] sm:$0xff] (%p36_p5) }
  0x17   : > { %271 = vst [vmem:[%s237_s19] sm:$0xff] (%p36_p5), %v270_v0  ;;  %273 = vst [vmem:[%s237_s19 + $0x8] sm:$0xff] (%p36_p5), %v272_v1 }
  0x1a PF: > { %p786_p10 = scmp.ge.s32.totalorder %s998_s27, 1  ;;  %p278_p11 = scmp.lt.s32.totalorder %s998_s27, 3 }
  0x1c   : > { %p279_p12 = pnand %p786_p10, %p278_p11 }
  0x1d   : > { %s285_s20 = sand.u32 (!%p279_p12), 1, %s990_s25   ;;  %v1000_v2 = vmov (!%p279_p12), 0   ;;  %v325_v3 = vld [vmem:[%s1209_s2] sm:$0xff] (!%p279_p12)  ;;  %v326_v6 = vld [vmem:[%s1209_s2 + $0x8] sm:$0xff] (!%p279_p12)  ;;  %v327_v7 = vld [vmem:[%s1209_s2 + $0x10] sm:$0xff] (!%p279_p12)  ;;  %vm369_vm0 = vcmask (!%p279_p12), 130048  }
  0x1e   : > { %282 = sbr.rel (%p279_p12) target bundleno = 784 (0x310), region = 82  ;;  %s1101_s21 = sshll.u32 (!%p279_p12), %s285_s20, 4  ;;  %408 = vmatprep.mubr.bf16.mxu0 (!%p279_p12), %v1000_v2  ;;  %863 = vset.pattern.permute.xlu0 (!%p279_p12), %v1000_v2  ;;  %v868_v8 = vld [vmem:[%s1208_s1] sm:$0xff] (!%p279_p12)   ;;  %v328_v9 = vld [vmem:[%s1209_s2 + $0x18] sm:$0xff] (!%p279_p12)  ;;  %v494_v11 = vld [vmem:[%s1211_s4 + $0x8] sm:$0xff] (!%p279_p12)  ;;  %vm527_vm1 = vcmask (!%p279_p12), 261120  }
  0x1f   : > { %864 = vset.pattern.permute.xlu1 (!%p279_p12), %v1000_v2  ;;  %566 = vmatprep.mubr.bf16.mxu1 (!%p279_p12), %v1000_v2  ;;  %s287_s29 = scalar_lea.vmem (!%p279_p12), [#allocation2], %s1101_s21  ;;  %v493_v10 = vld [vmem:[%s1211_s4] sm:$0xff] (!%p279_p12)  ;;  %v495_v12 = vld [vmem:[%s1211_s4 + $0x10] sm:$0xff] (!%p279_p12)  ;;  %v869_v13 = vld [vmem:[%s1208_s1 + $0x8] sm:$0xff] (!%p279_p12)   ;;  %s822_s13 = sshll.u32 (!%p279_p12), %s779_s28, 8 }
  0x20   : > { %v865_v4 = vld [vmem:[%s287_s29 + $0x4] ss:$8 sps:$4 sm:$0xff] (!%p279_p12)   ;;  %331 = vperm.xlu0 (!%p279_p12), %863, %v325_v3   ;;  %v867_v5 = vld [vmem:[%s287_s29] ss:$8 sps:$4 sm:$0xff] (!%p279_p12)   ;;  %341 = vperm.xlu1 (!%p279_p12), %864, %v327_v7   ;;  %s315_s14 = scalar_lea.vmem (!%p279_p12), [#allocation3], %s1101_s21  ;;  %s1162_s18 = scalar_lea.hbm (!%p279_p12), %s1214_s7, %s822_s13 }
  0x21   : > { %376 = vmatprep.subr.bf16.mxu0 (!%p279_p12), %v865_v4  ;;  %v496_v14 = vld [vmem:[%s1211_s4 + $0x18] sm:$0xff] (!%p279_p12)  ;;  %v648_v15 = vld [vmem:[%s1213_s6] sm:$0xff] (!%p279_p12)  ;;  %s715_s15 = sshll.u32 (!%p279_p12), %s315_s14, 4  ;;  %s701_s28 = scalar_lea.sflag (!%p279_p12), [#allocation4], %s285_s20  ;;  %s1164_s15 = int_to_ptr.vmem [resolvable:$true] %s715_s15 }
  0x22   : > { %377 = vmatpush1.bf16.msra.mxu0 (!%p279_p12), %v867_v5  ;;  %s936_s21 = scalar_lea.vmem (!%p279_p12), %s1164_s15, 256  ;;  %s1001_s19 = smov (!%p279_p12), [#allocation3]  }
  0x23   : > { %p937_p13 = scmp.ne.s32.totalorder (!%p279_p12), %s1164_s15, %s936_s21  ;;  %s940_s22 = sshll.u32 (!%p279_p12), %s1001_s19, 4  ;;  %s941_s22 = int_to_ptr.vmem [resolvable:$false] %s940_s22 }
  0x24   : > { %336 = vperm.xlu0 (!%p279_p12), %863, %v326_v6   ;;  %346 = vperm.xlu1 (!%p279_p12), %864, %v328_v9   ;;  %s942_s23 = scalar_lea.vmem (!%p279_p12), %s941_s22, 512  ;;  %p943_p2 = scmp.lt.s32.totalorder (!%p279_p12), %s1164_s15, %s941_s22 }
  0x25   : > { %793 = vmatmul.mubr.msk.bf16.vlgmr.msra.gmra.mrb[0].mxu0 %vm369_vm0, %v868_v8  ;;  %p938_p0 = pnand %p937_p13, %p1080_p6  ;;  %p944_p3 = scmp.lt.s32.totalorder %s942_s23, %s936_s21 }
  0x26   : > { %418 = vmatprep.mubr.bf16.mxu0 %v1000_v2 }
  0x27   : > { %p939_p1 = pneg %p938_p0  ;;  %p945_p4 = por %p944_p3, %p943_p2 }
  0x28   : > { %499 = vperm.xlu0 %863, %v493_v10   ;;  %504 = vperm.xlu1 %864, %v494_v11  }
  0x29   : > { %p946_p5 = pnand %p945_p4, %p939_p1 }
  0x2c   : > { %509 = vperm.xlu0 %863, %v495_v12   ;;  %514 = vperm.xlu1 %864, %v496_v14  }
  0x2d   : > { %794 = vmatmul.mubr.msk.bf16.gmra.mrb[4].mxu0 %vm369_vm0, %v869_v13 }
  0x2e   : > { %689 = vmatprep.mubr.bf16.mxu0 %v1000_v2 }
  0x30   : > { %651 = vperm.xlu0 %863, %v648_v15  }
  0x9f   : > { %v332_v16 = vpop.permute.xlu0 %331  ;;  %v342_v26 = vpop.permute.xlu1 %341 }
  0xa3   : > { %v337_v20 = vpop.permute.xlu0 %336  ;;  %v347_v34 = vpop.permute.xlu1 %346 }
  0xf8   : > { %v410_v17 = vpop.f32.mrb[0].mxu0 }
  0xf9   : > { %v411_v18 = vadd.f32 %v410_v17, %v332_v16  ;;  %v412_v19 = vpop.f32.mrb[1].mxu0  ;;  %v870_v17 = vld [vmem:[%s1210_s3] sm:$0xff]  }
  0xfa   : > { %v413_v21 = vadd.f32 %v412_v19, %v332_v16  ;;  %v414_v22 = vpop.f32.mrb[2].mxu0  ;;  %v500_v19 = vpop.permute.xlu0 %499 }
  0xfb   : > { %v795_v23 = vmul.f32 -1.442695, %v411_v18  ;;  %v415_v24 = vadd.f32 %v414_v22, %v337_v20  ;;  %v416_v25 = vpop.f32.mrb[3].mxu0 }
  0xfc   : > { %v796_v27 = vmul.f32 -1.442695, %v413_v21  ;;  %v417_v28 = vadd.f32 %v416_v25, %v337_v20 }
  0xfd   : > { %872 = vpow2.f32 %v795_v23  ;;  %v797_v29 = vmul.f32 -1.442695, %v415_v24  ;;  %v505_v23 = vpop.permute.xlu1 %504 }
  0xfe   : > { %874 = vpow2.f32 %v796_v27  ;;  %v798_v30 = vmul.f32 -1.442695, %v417_v28 }
  0xff   : > { %876 = vpow2.f32 %v797_v29 }
 0x100   : > { %878 = vpow2.f32 %v798_v30  ;;  %v420_v31 = vpop.f32.mrb[4].mxu0 }
 0x101   : > { %v421_v32 = vadd.f32 %v420_v31, %v342_v26  ;;  %v422_v33 = vpop.f32.mrb[5].mxu0 }
 0x102   : > { %v423_v35 = vadd.f32 %v422_v33, %v342_v26  ;;  %v424_v36 = vpop.f32.mrb[6].mxu0 }
 0x103   : > { %v799_v37 = vmul.f32 -1.442695, %v421_v32  ;;  %v425_v38 = vadd.f32 %v424_v36, %v347_v34  ;;  %v426_v39 = vpop.f32.mrb[7].mxu0  ;;  %v515_v36 = vpop.permute.xlu1 %514 }
 0x104   : > { %v800_v40 = vmul.f32 -1.442695, %v423_v35  ;;  %v427_v41 = vadd.f32 %v426_v39, %v347_v34 }
 0x105   : > { %880 = vpow2.f32 %v799_v37  ;;  %v801_v42 = vmul.f32 -1.442695, %v425_v38 }
 0x106   : > { %882 = vpow2.f32 %v800_v40  ;;  %v802_v43 = vmul.f32 -1.442695, %v427_v41 }
 0x107   : > { %v873_v44 = vpop.eup %872  ;;  %884 = vpow2.f32 %v801_v42 }
 0x108   : > { %v875_v45 = vpop.eup %874  ;;  %v453_v46 = vadd.f32 1.0, %v873_v44  ;;  %886 = vpow2.f32 %v802_v43 }
 0x109   : > { %v877_v47 = vpop.eup %876  ;;  %v454_v48 = vadd.f32 1.0, %v875_v45 }
 0x10a   : > { %v879_v49 = vpop.eup %878  ;;  %888 = vrcp.f32 %v453_v46  ;;  %v455_v50 = vadd.f32 1.0, %v877_v47 }
 0x10b   : > { %890 = vrcp.f32 %v454_v48  ;;  %v456_v51 = vadd.f32 1.0, %v879_v49 }
 0x10c   : > { %892 = vrcp.f32 %v455_v50 }
 0x10d   : > { %894 = vrcp.f32 %v456_v51 }
 0x10f   : > { %v881_v52 = vpop.eup %880 }
 0x110   : > { %v883_v53 = vpop.eup %882  ;;  %v457_v54 = vadd.f32 1.0, %v881_v52 }
 0x111   : > { %v885_v55 = vpop.eup %884  ;;  %v458_v56 = vadd.f32 1.0, %v883_v53 }
 0x112   : > { %v887_v57 = vpop.eup %886  ;;  %896 = vrcp.f32 %v457_v54  ;;  %v459_v58 = vadd.f32 1.0, %v885_v55 }
 0x113   : > { %898 = vrcp.f32 %v458_v56  ;;  %v460_v59 = vadd.f32 1.0, %v887_v57 }
 0x114   : > { %v889_v60 = vpop.eup %888  ;;  %900 = vrcp.f32 %v459_v58 }
 0x115   : > { %v891_v61 = vpop.eup %890  ;;  %902 = vrcp.f32 %v460_v59  ;;  %v477_v0 = vmul.f32 %v889_v60, %v411_v18  ;;  %v871_v18 = vld [vmem:[%s1210_s3 + $0x8] sm:$0xff]  }
 0x116   : > { %v893_v62 = vpop.eup %892  ;;  %v478_v3 = vmul.f32 %v891_v61, %v413_v21 }
 0x117   : > { %v895_v63 = vpop.eup %894  ;;  %v479_v1 = vmul.f32 %v893_v62, %v415_v24 }
 0x118   : > { %v480_v4 = vmul.f32 %v895_v63, %v417_v28 }
 0x119   : > { %v489_v5 = vpack.c.bf16 %v479_v1, %v477_v0 }
 0x11a   : > { %v490_v6 = vpack.c.bf16 %v480_v4, %v478_v3 }
 0x11c   : > { %v897_v7 = vpop.eup %896  ;;  %534 = vmatprep.subr.bf16.mxu1 %v490_v6 }
 0x11d   : > { %v899_v8 = vpop.eup %898  ;;  %535 = vmatpush1.bf16.msra.mxu1 %v489_v5  ;;  %v481_v11 = vmul.f32 %v897_v7, %v421_v32  ;;  %v510_v32 = vpop.permute.xlu0 %509 }
 0x11e   : > { %v901_v9 = vpop.eup %900  ;;  %v482_v13 = vmul.f32 %v899_v8, %v423_v35 }
 0x11f   : > { %v903_v10 = vpop.eup %902  ;;  %v483_v12 = vmul.f32 %v901_v9, %v425_v38 }
 0x120   : > { %v484_v14 = vmul.f32 %v903_v10, %v427_v41 }
 0x121   : > { %v491_v15 = vpack.c.bf16 %v483_v12, %v481_v11 }
 0x122   : > { %v492_v16 = vpack.c.bf16 %v484_v14, %v482_v13 }
 0x124   : > { %536 = vmatprep.subr.bf16.mxu1 %v492_v16 }
 0x125   : > { %537 = vmatpush1.bf16.msra.mxu1 %v491_v15 }
 0x128   : > { %805 = vmatmul.mubr.msk.bf16.vlgmr.msra.gmra.mrb[0].mxu1 %vm527_vm1, %v870_v17 }
 0x129   : > { %576 = vmatprep.mubr.bf16.mxu1 %v1000_v2 }
 0x130   : > { %806 = vmatmul.mubr.msk.bf16.gmra.mrb[4].mxu1 %vm527_vm1, %v871_v18 }
 0x1fb   : > { %v568_v20 = vpop.f32.mrb[0].mxu1 }
 0x1fc   : > { %v569_v21 = vadd.f32 %v568_v20, %v500_v19  ;;  %v570_v22 = vpop.f32.mrb[1].mxu1  ;;  %v652_v20 = vpop.permute.xlu0 %651 }
 0x1fd   : > { %v571_v24 = vadd.f32 %v570_v22, %v500_v19  ;;  %v572_v25 = vpop.f32.mrb[2].mxu1  ;;  %v643_v19 = vld [vmem:[%s1212_s5] sm:$0xf] }
 0x1fe   : > { %v807_v26 = vmul.f32 -1.442695, %v569_v21  ;;  %v573_v27 = vadd.f32 %v572_v25, %v505_v23  ;;  %v574_v28 = vpop.f32.mrb[3].mxu1 }
 0x1ff   : > { %v808_v29 = vmul.f32 -1.442695, %v571_v24  ;;  %v575_v30 = vadd.f32 %v574_v28, %v505_v23 }
 0x200   : > { %904 = vpow2.f32 %v807_v26  ;;  %v809_v2 = vmul.f32 -1.442695, %v573_v27 }
 0x201   : > { %906 = vpow2.f32 %v808_v29  ;;  %v810_v31 = vmul.f32 -1.442695, %v575_v30 }
 0x202   : > { %908 = vpow2.f32 %v809_v2 }
 0x203   : > { %910 = vpow2.f32 %v810_v31  ;;  %v578_v33 = vpop.f32.mrb[4].mxu1 }
 0x204   : > { %v579_v34 = vadd.f32 %v578_v33, %v510_v32  ;;  %v580_v35 = vpop.f32.mrb[5].mxu1 }
 0x205   : > { %v581_v37 = vadd.f32 %v580_v35, %v510_v32  ;;  %v582_v38 = vpop.f32.mrb[6].mxu1 }
 0x206   : > { %v811_v39 = vmul.f32 -1.442695, %v579_v34  ;;  %v583_v40 = vadd.f32 %v582_v38, %v515_v36  ;;  %v584_v41 = vpop.f32.mrb[7].mxu1 }
 0x207   : > { %v812_v42 = vmul.f32 -1.442695, %v581_v37  ;;  %v585_v43 = vadd.f32 %v584_v41, %v515_v36 }
 0x208   : > { %912 = vpow2.f32 %v811_v39  ;;  %v813_v44 = vmul.f32 -1.442695, %v583_v40 }
 0x209   : > { %914 = vpow2.f32 %v812_v42  ;;  %v814_v45 = vmul.f32 -1.442695, %v585_v43 }
 0x20a   : > { %v905_v46 = vpop.eup %904  ;;  %916 = vpow2.f32 %v813_v44 }
 0x20b   : > { %v907_v47 = vpop.eup %906  ;;  %v611_v48 = vadd.f32 1.0, %v905_v46  ;;  %918 = vpow2.f32 %v814_v45 }
 0x20c   : > { %v909_v49 = vpop.eup %908  ;;  %v612_v50 = vadd.f32 1.0, %v907_v47 }
 0x20d   : > { %v911_v51 = vpop.eup %910  ;;  %920 = vrcp.f32 %v611_v48  ;;  %v613_v52 = vadd.f32 1.0, %v909_v49 }
 0x20e   : > { %922 = vrcp.f32 %v612_v50  ;;  %v614_v53 = vadd.f32 1.0, %v911_v51 }
 0x20f   : > { %924 = vrcp.f32 %v613_v52 }
 0x210   : > { %926 = vrcp.f32 %v614_v53 }
 0x212   : > { %v913_v54 = vpop.eup %912 }
 0x213   : > { %v915_v55 = vpop.eup %914  ;;  %v615_v56 = vadd.f32 1.0, %v913_v54 }
 0x214   : > { %v917_v57 = vpop.eup %916  ;;  %v616_v58 = vadd.f32 1.0, %v915_v55 }
 0x215   : > { %v919_v59 = vpop.eup %918  ;;  %928 = vrcp.f32 %v615_v56  ;;  %v617_v60 = vadd.f32 1.0, %v917_v57 }
 0x216   : > { %930 = vrcp.f32 %v616_v58  ;;  %v618_v61 = vadd.f32 1.0, %v919_v59 }
 0x217   : > { %v921_v62 = vpop.eup %920  ;;  %932 = vrcp.f32 %v617_v60 }
 0x218   : > { %v923_v63 = vpop.eup %922  ;;  %934 = vrcp.f32 %v618_v61  ;;  %v635_v3 = vmul.f32 %v921_v62, %v569_v21 }
 0x219   : > { %v925_v0 = vpop.eup %924  ;;  %v636_v5 = vmul.f32 %v923_v63, %v571_v24 }
 0x21a   : > { %v927_v1 = vpop.eup %926  ;;  %v637_v4 = vmul.f32 %v925_v0, %v573_v27 }
 0x21b   : > { %v638_v6 = vmul.f32 %v927_v1, %v575_v30 }
 0x21c   : > { %v644_v7 = vpack.c.bf16 %v637_v4, %v635_v3 }
 0x21d   : > { %v645_v8 = vpack.c.bf16 %v638_v6, %v636_v5 }
 0x21f   : > { %v929_v9 = vpop.eup %928  ;;  %657 = vmatprep.subr.bf16.mxu0 %v645_v8 }
 0x220   : > { %v931_v10 = vpop.eup %930  ;;  %658 = vmatpush1.bf16.msra.mxu0 %v644_v7  ;;  %v639_v13 = vmul.f32 %v929_v9, %v579_v34 }
 0x221   : > { %v933_v11 = vpop.eup %932  ;;  %v640_v15 = vmul.f32 %v931_v10, %v581_v37 }
 0x222   : > { %v935_v12 = vpop.eup %934  ;;  %v641_v14 = vmul.f32 %v933_v11, %v583_v40 }
 0x223   : > { %v642_v16 = vmul.f32 %v935_v12, %v585_v43 }
 0x224   : > { %v646_v17 = vpack.c.bf16 %v641_v14, %v639_v13 }
 0x225   : > { %v647_v18 = vpack.c.bf16 %v642_v16, %v640_v15 }
 0x227   : > { %659 = vmatprep.subr.bf16.mxu0 %v647_v18 }
 0x228   : > { %660 = vmatpush1.bf16.msra.mxu0 %v646_v17 }
 0x22b   : > { %815 = vmatmul.mubr.msk.bf16.vlgmr.msra.gmra.mrb[8].mxu0 %vm527_vm1, %v643_v19 }
 0x2fe   : > { %v691_v21 = vpop.f32.mrb[8].mxu0 }
 0x2ff   : > { %v692_v22 = vadd.f32 %v691_v21, %v652_v20  ;;  %v693_v23 = vpop.f32.mrb[9].mxu0 }
 0x300   : > { %v694_v24 = vadd.f32 %v693_v23, %v652_v20  ;;  %v695_v25 = vpop.f32.mrb[10].mxu0 }
 0x301   : > { %698 = vst [vmem:[%s315_s14] sm:$0xff] %v692_v22  ;;  %v696_v26 = vpop.f32.mrb[11].mxu0 }
 0x302   : > { %699 = vst [vmem:[%s315_s14 + $0x8] sm:$0xff] %v694_v24 }
 0x303   : > { %949 = shalt.err (!%p946_p5)
}
 0x304   : > { %s950_s20 = scalar_lea.hbm %s1162_s18, 256  ;;  %s954_s9 = scalar_lea.hbm %s1214_s7, 512 }
 0x305   : > { %p951_p7 = scmp.ne.s32.totalorder %s1162_s18, %s950_s20  ;;  %p955_p12 = scmp.lt.u32.totalorder %s1162_s18, %s1214_s7 }
 0x306   : > { %p956_p13 = scmp.lt.u32.totalorder %s954_s9, %s950_s20  ;;  %p958_p1 = scmp.lt.u32.totalorder %s950_s20, %s1162_s18 }
 0x307   : > { %p952_p10 = pnand %p951_p7, %p1080_p6 }
 0x308   : > { %p957_p0 = por %p956_p13, %p955_p12 }
 0x309   : > { %p953_p11 = pneg %p952_p10 }
 0x30a   : > { %p959_p2 = por %p958_p1, %p957_p0 }
 0x30c   : > { %p960_p3 = pnand %p959_p2, %p953_p11 }
 0x30e   : > { %963 = shalt.err (!%p960_p3)
}
 0x30f   : > { %823 = dma.vmem_to_hbm [thread:$0]  (%p1080_p6), %s1164_s15, 256, %s1162_s18, %s701_s28  }
 0x310 PF: > { %s727_s16 = sand.u32 1, %s986_s24   ;;  %p826_p4 = pnand %p782_p9, %p1084_p8 }
 0x311   : > { %s728_s17 = scalar_lea.sflag [#allocation4], %s727_s16 }
 0x312   : > { %981 = dma.done.wait (!%p826_p4), %s728_s17, 256  }
 0x313   : > { %983 = vsyncadd (!%p826_p4), %s728_s17, 4294967040  ;;  %p17_p5 = scmp.ge.s32.totalorder %s1065_s30, 4   ;;  %s1217_s24 = smov %s990_s25 }
 0x314   : > { %s1218_s25 = smov %s994_s26  ;;  %s1219_s26 = smov %s1078_s10 }
 0x315   : > { %s1220_s27 = smov %s1065_s30  ;;  %19 = sbr.rel (!%p17_p5) target bundleno = 3 (0x3), region = 126 }
 0x31c   :  { %733 = vsyncpa [#allocation4], 1 }
 0x31d   :  { %735 = vsyncpa [#allocation4 + $0x1], 1 }

</bundles_post_ra>
